<compile_context>
chip_gen: v7x
topology: tpu7x:2x2x1
jax: 0.10.0
libtpu: 0.0.40
codegen_flags: <defaults>
</compile_context>

<pallas_src>
import functools
import math

import jax
import jax.numpy as jnp
from jax.experimental import pallas as pl
from jax.experimental.pallas import tpu as pltpu

NUM_BLOCKS = 3
BN_EPS = 1e-5
LEAKY_SLOPE = 0.2
LANE = 128


def _leaky_relu(x):
    return jnp.where(x > 0, x, LEAKY_SLOPE * x)


def _ceil_to(x, m):
    return ((x + m - 1) // m) * m


def _device_kind():
    try:
        return str(jax.devices()[0].device_kind).lower()
    except Exception:
        return ""


def _num_tensorcores():
    """Best-effort TensorCore count of the local chip (1 on v5e/v6e, 2 on v7x)."""
    try:
        dev = jax.devices()[0]
    except Exception:
        return 1
    n = getattr(dev, "num_cores", None)
    if isinstance(n, int) and n > 0:
        return n
    kind = _device_kind()
    return 2 if ("v7" in kind or "v5p" in kind or "v4" in kind) else 1


def _generator_kernel(noise_ref, w_in_ref, b_in_ref,
                      blk_w1_ref, blk_b_ref, blk_w2_ref,
                      w_out_ref, b_out_ref, out_ref,
                      *, num_blocks, fuse_residual, bf16_tanh):
    """One batch tile through the full generator (straight-line, unrolled)."""
    # input projection (no activation, matching the PyTorch module); noise is
    # already bf16 so the MXU consumes it directly, f32 accumulation.
    x = jnp.dot(noise_ref[...], w_in_ref[...],
                preferred_element_type=jnp.float32) + b_in_ref[...]

    # residual blocks; BatchNorm pre-folded into w/b, Dropout = identity (eval)
    for i in range(num_blocks):
        x_b = x.astype(jnp.bfloat16)
        h = jnp.dot(x_b, blk_w1_ref[i],
                    preferred_element_type=jnp.float32) + blk_b_ref[i, 0]
        h = _leaky_relu(h)                       # LeakyReLU(0.2)
        if fuse_residual:
            # [h | residual] @ [W2' ; I] : the skip connection rides the idle
            # K lanes of the 256x256 MXU (v6e/v7x only).
            hk = jnp.concatenate([h.astype(jnp.bfloat16), x_b], axis=-1)
            h = jnp.dot(hk, blk_w2_ref[i],
                        preferred_element_type=jnp.float32) + blk_b_ref[i, 1]
            x = _leaky_relu(h)
        else:
            h = jnp.dot(h.astype(jnp.bfloat16), blk_w2_ref[i],
                        preferred_element_type=jnp.float32) + blk_b_ref[i, 1]
            x = _leaky_relu(h + x)               # residual add + LeakyReLU

    # output projection + Tanh (output padded to a lane-dense 128-wide slab)
    y = jnp.dot(x.astype(jnp.bfloat16), w_out_ref[...],
                preferred_element_type=jnp.float32) + b_out_ref[...]
    if bf16_tanh:
        out_ref[...] = jnp.tanh(y.astype(jnp.bfloat16)).astype(out_ref.dtype)
    else:
        out_ref[...] = jnp.tanh(y).astype(out_ref.dtype)


def residual_threat_generator(noise, packed, *, tile_b=None,
                              out_dtype=jnp.bfloat16, return_padded=False):
    """Run the Pallas kernel. `packed` comes from fold_and_pack()."""
    B, Z = noise.shape
    Zp = packed["w_in"].shape[0]
    Dp = packed["w_out"].shape[1]
    D = packed["output_dim"]
    nb = packed["blk_w1"].shape[0]
    n_cores = _num_tensorcores()

    # Batch tiling: target 512 rows/step (amortizes ~0.35us per-step overhead
    # and MXU weight push/drain); cap at ~B/num_cores so multi-TC chips get
    # >= 2 grid steps; pad B up to a tile multiple instead of shrinking tiles.
    if tile_b is None:
        tile_b = min(_ceil_to(B, 8), 512)
        if n_cores > 1 and B > 8:
            tile_b = min(tile_b, _ceil_to(pl.cdiv(B, n_cores), 8))
    tile_b = max(8, _ceil_to(int(tile_b), 8))
    Bp = _ceil_to(B, tile_b)

    # bf16, lane-dense, row-padded noise (single streaming input of the kernel)
    noise = noise.astype(jnp.bfloat16)
    pad_r, pad_c = Bp - B, Zp - Z
    if pad_r or pad_c:
        noise = jnp.pad(noise, ((0, pad_r), (0, pad_c)))

    ordered_keys = ("w_in", "b_in", "blk_w1", "blk_b", "blk_w2", "w_out", "b_out")
    ordered = [packed[k] for k in ordered_keys]

    def resident_spec(arr):
        nd = arr.ndim
        return pl.BlockSpec(arr.shape, lambda i, _n=nd: (0,) * _n)

    kernel = functools.partial(
        _generator_kernel,
        num_blocks=nb,
        fuse_residual=packed["fuse_residual"],
        bf16_tanh=packed["bf16_tanh"],
    )

    out = pl.pallas_call(
        kernel,
        out_shape=jax.ShapeDtypeStruct((Bp, Dp), out_dtype),
        grid_spec=pltpu.PrefetchScalarGridSpec(
            num_scalar_prefetch=0,
            grid=(Bp // tile_b,),
            in_specs=([pl.BlockSpec((tile_b, Zp), lambda i: (i, 0))]
                      + [resident_spec(a) for a in ordered]),
            out_specs=pl.BlockSpec((tile_b, Dp), lambda i: (i, 0)),
        ),
        compiler_params=pltpu.CompilerParams(
            dimension_semantics=("parallel",)),   # shards across TCs when grid > 1
    )(noise, *ordered)

    if return_padded:
        return out            # avoid the extra HBM read+write of a host slice
    return out[:B, :D]


def init_params(key, noise_dim, output_dim, num_blocks=NUM_BLOCKS, hidden_dim=128):
    """Init matching the module: Linear = xavier_uniform / zero bias (stored as
    (in, out) so forward is x @ W + b); fresh BatchNorm1d params & running stats."""
    def xavier(k, fan_in, fan_out):
        bound = math.sqrt(6.0 / (fan_in + fan_out))
        return jax.random.uniform(k, (fan_in, fan_out), jnp.float32, -bound, bound)

    keys = jax.random.split(key, 2 + 2 * num_blocks)
    nb, H = num_blocks, hidden_dim
    return {
        "w_in": xavier(keys[0], noise_dim, H),
        "b_in": jnp.zeros((H,), jnp.float32),
        "blk_w1": jnp.stack([xavier(keys[2 + 2 * i], H, H) for i in range(nb)]),
        "blk_b1": jnp.zeros((nb, H), jnp.float32),
        "blk_w2": jnp.stack([xavier(keys[3 + 2 * i], H, H) for i in range(nb)]),
        "blk_b2": jnp.zeros((nb, H), jnp.float32),
        "w_out": xavier(keys[1], H, output_dim),
        "b_out": jnp.zeros((output_dim,), jnp.float32),
        # BatchNorm1d (fresh init; used in eval mode)
        "bn1_gamma": jnp.ones((nb, H), jnp.float32),
        "bn1_beta": jnp.zeros((nb, H), jnp.float32),
        "bn1_mean": jnp.zeros((nb, H), jnp.float32),
        "bn1_var": jnp.ones((nb, H), jnp.float32),
        "bn2_gamma": jnp.ones((nb, H), jnp.float32),
        "bn2_beta": jnp.zeros((nb, H), jnp.float32),
        "bn2_mean": jnp.zeros((nb, H), jnp.float32),
        "bn2_var": jnp.ones((nb, H), jnp.float32),
    }


def fold_and_pack(params, *, lane=LANE, weight_dtype=jnp.bfloat16,
                  fuse_residual=None, bf16_tanh=None):
    """Host-side prep: fold eval-mode BN into the preceding Linear, zero-pad
    noise/output dims to lane multiples, cast matmul weights to bf16, pack the
    per-block biases, and (on v6e/v7x) append an identity to W2 so the residual
    add runs on the MXU's idle K lanes."""
    kind = _device_kind()
    wide_mxu = ("v6" in kind) or ("v7" in kind)
    if fuse_residual is None:
        fuse_residual = wide_mxu
    if bf16_tanh is None:
        bf16_tanh = wide_mxu

    Z, H = params["w_in"].shape
    D = params["w_out"].shape[1]
    nb = params["blk_w1"].shape[0]
    assert H % lane == 0, "hidden_dim must be a multiple of 128"

    Zp, Dp = _ceil_to(Z, lane), _ceil_to(D, lane)

    # BN(h) = (h - mean)/sqrt(var+eps)*gamma + beta  ==  h*s + t
    s1 = params["bn1_gamma"] / jnp.sqrt(params["bn1_var"] + BN_EPS)
    t1 = params["bn1_beta"] - params["bn1_mean"] * s1
    s2 = params["bn2_gamma"] / jnp.sqrt(params["bn2_var"] + BN_EPS)
    t2 = params["bn2_beta"] - params["bn2_mean"] * s2

    blk_w1 = params["blk_w1"] * s1[:, None, :]     # scale output columns
    blk_b1 = params["blk_b1"] * s1 + t1
    blk_w2 = params["blk_w2"] * s2[:, None, :]
    blk_b2 = params["blk_b2"] * s2 + t2

    if fuse_residual:
        eye = jnp.broadcast_to(jnp.eye(H, dtype=blk_w2.dtype), (nb, H, H))
        blk_w2 = jnp.concatenate([blk_w2, eye], axis=1)      # (nb, 2H, H)

    w_in = jnp.pad(params["w_in"], ((0, Zp - Z), (0, 0)))     # zero rows for padded noise
    w_out = jnp.pad(params["w_out"], ((0, 0), (0, Dp - D)))   # zero cols, sliced off later
    b_out = jnp.pad(params["b_out"], ((0, Dp - D),))

    blk_b = jnp.stack([blk_b1, blk_b2], axis=1).reshape(nb, 2, 1, H)

    return {
        "w_in": w_in.astype(weight_dtype),
        "b_in": params["b_in"].reshape(1, H).astype(jnp.float32),
        "blk_w1": blk_w1.astype(weight_dtype),
        "blk_b": blk_b.astype(jnp.float32),
        "blk_w2": blk_w2.astype(weight_dtype),
        "w_out": w_out.astype(weight_dtype),
        "b_out": b_out.reshape(1, Dp).astype(jnp.float32),
        "output_dim": D,
        "fuse_residual": bool(fuse_residual),
        "bf16_tanh": bool(bf16_tanh),
    }


def reference_forward(noise, params):
    """Pure-JAX f32 reference with the module's eval-mode semantics."""
    def bn(h, g, b, m, v):
        return (h - m) / jnp.sqrt(v + BN_EPS) * g + b

    x = noise @ params["w_in"] + params["b_in"]
    nb = params["blk_w1"].shape[0]
    for i in range(nb):
        residual = x
        h = x @ params["blk_w1"][i] + params["blk_b1"][i]
        h = bn(h, params["bn1_gamma"][i], params["bn1_beta"][i],
               params["bn1_mean"][i], params["bn1_var"][i])
        h = jnp.where(h > 0, h, LEAKY_SLOPE * h)
        h = h @ params["blk_w2"][i] + params["blk_b2"][i]
        h = bn(h, params["bn2_gamma"][i], params["bn2_beta"][i],
               params["bn2_mean"][i], params["bn2_var"][i])
        x = h + residual
        x = jnp.where(x > 0, x, LEAKY_SLOPE * x)
    return jnp.tanh(x @ params["w_out"] + params["b_out"])


if __name__ == "__main__":
    key = jax.random.PRNGKey(0)
    k_noise, k_params = jax.random.split(key)

    batch, noise_dim, hidden_dim, output_dim = 16, 64, 128, 32

    noise = jax.random.normal(k_noise, (batch, noise_dim), jnp.float32)
    params = init_params(k_params, noise_dim, output_dim,
                         num_blocks=NUM_BLOCKS, hidden_dim=hidden_dim)
    packed = fold_and_pack(params)

    out = residual_threat_generator(noise, packed)
    out = jax.block_until_ready(out)

    ref = reference_forward(noise, params)
    assert out.shape == (batch, output_dim)
    # bf16 noise/weights/output vs an f32 reference -> loosened tolerance
    assert jnp.allclose(out.astype(jnp.float32), ref, atol=5e-2, rtol=5e-2), \
        "mismatch vs reference"

    print("KERNEL_OK")
</pallas_src>

<mosaic_0001>
module attributes {stable_mosaic.version = 11 : i64} {
  func.func @_generator_kernel(%arg0: i32, %arg1: memref<16x128xbf16, #tpu.memory_space<vmem>>, %arg2: memref<128x128xbf16, #tpu.memory_space<vmem>>, %arg3: memref<1x128xf32, #tpu.memory_space<vmem>>, %arg4: memref<3x128x128xbf16, #tpu.memory_space<vmem>>, %arg5: memref<3x2x1x128xf32, #tpu.memory_space<vmem>>, %arg6: memref<3x128x128xbf16, #tpu.memory_space<vmem>>, %arg7: memref<128x128xbf16, #tpu.memory_space<vmem>>, %arg8: memref<1x128xf32, #tpu.memory_space<vmem>>, %arg9: memref<16x128xbf16, #tpu.memory_space<vmem>>) attributes {dimension_semantics = [#tpu.dimension_semantics<parallel>], iteration_bounds = array<i64: 1>, scalar_prefetch = 0 : i64, scratch_operands = 0 : i64, tpu.core_type = #tpu.core_type<tc>, window_params = [{transform_indices = @transform_0, window_bounds = array<i64: 16, 128>}, {pipeline_mode = #tpu.pipeline_mode<synchronous>, transform_indices = @transform_1, window_bounds = array<i64: 128, 128>}, {pipeline_mode = #tpu.pipeline_mode<synchronous>, transform_indices = @transform_2, window_bounds = array<i64: 1, 128>}, {pipeline_mode = #tpu.pipeline_mode<synchronous>, transform_indices = @transform_3, window_bounds = array<i64: 3, 128, 128>}, {pipeline_mode = #tpu.pipeline_mode<synchronous>, transform_indices = @transform_4, window_bounds = array<i64: 3, 2, 1, 128>}, {pipeline_mode = #tpu.pipeline_mode<synchronous>, transform_indices = @transform_5, window_bounds = array<i64: 3, 128, 128>}, {pipeline_mode = #tpu.pipeline_mode<synchronous>, transform_indices = @transform_6, window_bounds = array<i64: 128, 128>}, {pipeline_mode = #tpu.pipeline_mode<synchronous>, transform_indices = @transform_7, window_bounds = array<i64: 1, 128>}, {transform_indices = @transform_8, window_bounds = array<i64: 16, 128>}]} {
    %c0 = arith.constant 0 : index
    %c0_0 = arith.constant 0 : index
    %0 = vector.load %arg1[%c0, %c0_0] : memref<16x128xbf16, #tpu.memory_space<vmem>>, vector<16x128xbf16>
    %c0_1 = arith.constant 0 : index
    %c0_2 = arith.constant 0 : index
    %1 = vector.load %arg2[%c0_1, %c0_2] : memref<128x128xbf16, #tpu.memory_space<vmem>>, vector<128x128xbf16>
    %cst = arith.constant dense<0.000000e+00> : vector<16x128xf32>
    %2 = tpu.matmul %0, %1, %cst {dimension_numbers = #tpu.dot_dimension_numbers<[1], [0], [0], [1], [0, 0, 1, 1], [], []>} : vector<16x128xbf16>, vector<128x128xbf16>, vector<16x128xf32> -> vector<16x128xf32>
    %c0_3 = arith.constant 0 : index
    %c0_4 = arith.constant 0 : index
    %3 = vector.load %arg3[%c0_3, %c0_4] : memref<1x128xf32, #tpu.memory_space<vmem>>, vector<1x128xf32>
    %4 = vector.broadcast %3 : vector<1x128xf32> to vector<16x128xf32>
    %5 = arith.addf %2, %4 : vector<16x128xf32>
    %6 = arith.truncf %5 : vector<16x128xf32> to vector<16x128xbf16>
    %c0_5 = arith.constant 0 : index
    %c0_6 = arith.constant 0 : index
    %c0_7 = arith.constant 0 : index
    %7 = vector.load %arg4[%c0_5, %c0_6, %c0_7] : memref<3x128x128xbf16, #tpu.memory_space<vmem>>, vector<1x128x128xbf16>
    %8 = vector.shape_cast %7 : vector<1x128x128xbf16> to vector<128x128xbf16>
    %cst_8 = arith.constant dense<0.000000e+00> : vector<16x128xf32>
    %9 = tpu.matmul %6, %8, %cst_8 {dimension_numbers = #tpu.dot_dimension_numbers<[1], [0], [0], [1], [0, 0, 1, 1], [], []>} : vector<16x128xbf16>, vector<128x128xbf16>, vector<16x128xf32> -> vector<16x128xf32>
    %c0_9 = arith.constant 0 : index
    %c0_10 = arith.constant 0 : index
    %c0_11 = arith.constant 0 : index
    %c0_12 = arith.constant 0 : index
    %10 = vector.load %arg5[%c0_9, %c0_10, %c0_11, %c0_12] : memref<3x2x1x128xf32, #tpu.memory_space<vmem>>, vector<1x1x1x128xf32>
    %11 = vector.shape_cast %10 : vector<1x1x1x128xf32> to vector<1x128xf32>
    %12 = vector.broadcast %11 : vector<1x128xf32> to vector<16x128xf32>
    %13 = arith.addf %9, %12 : vector<16x128xf32>
    %cst_13 = arith.constant 0.000000e+00 : f32
    %14 = vector.broadcast %cst_13 : f32 to vector<16x128xf32>
    %15 = arith.cmpf ogt, %13, %14 : vector<16x128xf32>
    %cst_14 = arith.constant 2.000000e-01 : f32
    %16 = vector.broadcast %cst_14 : f32 to vector<16x128xf32>
    %17 = arith.mulf %16, %13 : vector<16x128xf32>
    %18 = arith.select %15, %13, %17 : vector<16x128xi1>, vector<16x128xf32>
    %19 = arith.truncf %18 : vector<16x128xf32> to vector<16x128xbf16>
    %c0_15 = arith.constant 0 : index
    %c0_16 = arith.constant 0 : index
    %c0_17 = arith.constant 0 : index
    %20 = vector.load %arg6[%c0_15, %c0_16, %c0_17] : memref<3x128x128xbf16, #tpu.memory_space<vmem>>, vector<1x128x128xbf16>
    %21 = vector.shape_cast %20 : vector<1x128x128xbf16> to vector<128x128xbf16>
    %cst_18 = arith.constant dense<0.000000e+00> : vector<16x128xf32>
    %22 = tpu.matmul %19, %21, %cst_18 {dimension_numbers = #tpu.dot_dimension_numbers<[1], [0], [0], [1], [0, 0, 1, 1], [], []>} : vector<16x128xbf16>, vector<128x128xbf16>, vector<16x128xf32> -> vector<16x128xf32>
    %c0_19 = arith.constant 0 : index
    %c1 = arith.constant 1 : index
    %c0_20 = arith.constant 0 : index
    %c0_21 = arith.constant 0 : index
    %23 = vector.load %arg5[%c0_19, %c1, %c0_20, %c0_21] : memref<3x2x1x128xf32, #tpu.memory_space<vmem>>, vector<1x1x1x128xf32>
    %24 = vector.shape_cast %23 : vector<1x1x1x128xf32> to vector<1x128xf32>
    %25 = vector.broadcast %24 : vector<1x128xf32> to vector<16x128xf32>
    %26 = arith.addf %22, %25 : vector<16x128xf32>
    %27 = arith.addf %26, %5 : vector<16x128xf32>
    %cst_22 = arith.constant 0.000000e+00 : f32
    %28 = vector.broadcast %cst_22 : f32 to vector<16x128xf32>
    %29 = arith.cmpf ogt, %27, %28 : vector<16x128xf32>
    %cst_23 = arith.constant 2.000000e-01 : f32
    %30 = vector.broadcast %cst_23 : f32 to vector<16x128xf32>
    %31 = arith.mulf %30, %27 : vector<16x128xf32>
    %32 = arith.select %29, %27, %31 : vector<16x128xi1>, vector<16x128xf32>
    %33 = arith.truncf %32 : vector<16x128xf32> to vector<16x128xbf16>
    %c1_24 = arith.constant 1 : index
    %c0_25 = arith.constant 0 : index
    %c0_26 = arith.constant 0 : index
    %34 = vector.load %arg4[%c1_24, %c0_25, %c0_26] : memref<3x128x128xbf16, #tpu.memory_space<vmem>>, vector<1x128x128xbf16>
    %35 = vector.shape_cast %34 : vector<1x128x128xbf16> to vector<128x128xbf16>
    %cst_27 = arith.constant dense<0.000000e+00> : vector<16x128xf32>
    %36 = tpu.matmul %33, %35, %cst_27 {dimension_numbers = #tpu.dot_dimension_numbers<[1], [0], [0], [1], [0, 0, 1, 1], [], []>} : vector<16x128xbf16>, vector<128x128xbf16>, vector<16x128xf32> -> vector<16x128xf32>
    %c1_28 = arith.constant 1 : index
    %c0_29 = arith.constant 0 : index
    %c0_30 = arith.constant 0 : index
    %c0_31 = arith.constant 0 : index
    %37 = vector.load %arg5[%c1_28, %c0_29, %c0_30, %c0_31] : memref<3x2x1x128xf32, #tpu.memory_space<vmem>>, vector<1x1x1x128xf32>
    %38 = vector.shape_cast %37 : vector<1x1x1x128xf32> to vector<1x128xf32>
    %39 = vector.broadcast %38 : vector<1x128xf32> to vector<16x128xf32>
    %40 = arith.addf %36, %39 : vector<16x128xf32>
    %cst_32 = arith.constant 0.000000e+00 : f32
    %41 = vector.broadcast %cst_32 : f32 to vector<16x128xf32>
    %42 = arith.cmpf ogt, %40, %41 : vector<16x128xf32>
    %cst_33 = arith.constant 2.000000e-01 : f32
    %43 = vector.broadcast %cst_33 : f32 to vector<16x128xf32>
    %44 = arith.mulf %43, %40 : vector<16x128xf32>
    %45 = arith.select %42, %40, %44 : vector<16x128xi1>, vector<16x128xf32>
    %46 = arith.truncf %45 : vector<16x128xf32> to vector<16x128xbf16>
    %c1_34 = arith.constant 1 : index
    %c0_35 = arith.constant 0 : index
    %c0_36 = arith.constant 0 : index
    %47 = vector.load %arg6[%c1_34, %c0_35, %c0_36] : memref<3x128x128xbf16, #tpu.memory_space<vmem>>, vector<1x128x128xbf16>
    %48 = vector.shape_cast %47 : vector<1x128x128xbf16> to vector<128x128xbf16>
    %cst_37 = arith.constant dense<0.000000e+00> : vector<16x128xf32>
    %49 = tpu.matmul %46, %48, %cst_37 {dimension_numbers = #tpu.dot_dimension_numbers<[1], [0], [0], [1], [0, 0, 1, 1], [], []>} : vector<16x128xbf16>, vector<128x128xbf16>, vector<16x128xf32> -> vector<16x128xf32>
    %c1_38 = arith.constant 1 : index
    %c1_39 = arith.constant 1 : index
    %c0_40 = arith.constant 0 : index
    %c0_41 = arith.constant 0 : index
    %50 = vector.load %arg5[%c1_38, %c1_39, %c0_40, %c0_41] : memref<3x2x1x128xf32, #tpu.memory_space<vmem>>, vector<1x1x1x128xf32>
    %51 = vector.shape_cast %50 : vector<1x1x1x128xf32> to vector<1x128xf32>
    %52 = vector.broadcast %51 : vector<1x128xf32> to vector<16x128xf32>
    %53 = arith.addf %49, %52 : vector<16x128xf32>
    %54 = arith.addf %53, %32 : vector<16x128xf32>
    %cst_42 = arith.constant 0.000000e+00 : f32
    %55 = vector.broadcast %cst_42 : f32 to vector<16x128xf32>
    %56 = arith.cmpf ogt, %54, %55 : vector<16x128xf32>
    %cst_43 = arith.constant 2.000000e-01 : f32
    %57 = vector.broadcast %cst_43 : f32 to vector<16x128xf32>
    %58 = arith.mulf %57, %54 : vector<16x128xf32>
    %59 = arith.select %56, %54, %58 : vector<16x128xi1>, vector<16x128xf32>
    %60 = arith.truncf %59 : vector<16x128xf32> to vector<16x128xbf16>
    %c2 = arith.constant 2 : index
    %c0_44 = arith.constant 0 : index
    %c0_45 = arith.constant 0 : index
    %61 = vector.load %arg4[%c2, %c0_44, %c0_45] : memref<3x128x128xbf16, #tpu.memory_space<vmem>>, vector<1x128x128xbf16>
    %62 = vector.shape_cast %61 : vector<1x128x128xbf16> to vector<128x128xbf16>
    %cst_46 = arith.constant dense<0.000000e+00> : vector<16x128xf32>
    %63 = tpu.matmul %60, %62, %cst_46 {dimension_numbers = #tpu.dot_dimension_numbers<[1], [0], [0], [1], [0, 0, 1, 1], [], []>} : vector<16x128xbf16>, vector<128x128xbf16>, vector<16x128xf32> -> vector<16x128xf32>
    %c2_47 = arith.constant 2 : index
    %c0_48 = arith.constant 0 : index
    %c0_49 = arith.constant 0 : index
    %c0_50 = arith.constant 0 : index
    %64 = vector.load %arg5[%c2_47, %c0_48, %c0_49, %c0_50] : memref<3x2x1x128xf32, #tpu.memory_space<vmem>>, vector<1x1x1x128xf32>
    %65 = vector.shape_cast %64 : vector<1x1x1x128xf32> to vector<1x128xf32>
    %66 = vector.broadcast %65 : vector<1x128xf32> to vector<16x128xf32>
    %67 = arith.addf %63, %66 : vector<16x128xf32>
    %cst_51 = arith.constant 0.000000e+00 : f32
    %68 = vector.broadcast %cst_51 : f32 to vector<16x128xf32>
    %69 = arith.cmpf ogt, %67, %68 : vector<16x128xf32>
    %cst_52 = arith.constant 2.000000e-01 : f32
    %70 = vector.broadcast %cst_52 : f32 to vector<16x128xf32>
    %71 = arith.mulf %70, %67 : vector<16x128xf32>
    %72 = arith.select %69, %67, %71 : vector<16x128xi1>, vector<16x128xf32>
    %73 = arith.truncf %72 : vector<16x128xf32> to vector<16x128xbf16>
    %c2_53 = arith.constant 2 : index
    %c0_54 = arith.constant 0 : index
    %c0_55 = arith.constant 0 : index
    %74 = vector.load %arg6[%c2_53, %c0_54, %c0_55] : memref<3x128x128xbf16, #tpu.memory_space<vmem>>, vector<1x128x128xbf16>
    %75 = vector.shape_cast %74 : vector<1x128x128xbf16> to vector<128x128xbf16>
    %cst_56 = arith.constant dense<0.000000e+00> : vector<16x128xf32>
    %76 = tpu.matmul %73, %75, %cst_56 {dimension_numbers = #tpu.dot_dimension_numbers<[1], [0], [0], [1], [0, 0, 1, 1], [], []>} : vector<16x128xbf16>, vector<128x128xbf16>, vector<16x128xf32> -> vector<16x128xf32>
    %c2_57 = arith.constant 2 : index
    %c1_58 = arith.constant 1 : index
    %c0_59 = arith.constant 0 : index
    %c0_60 = arith.constant 0 : index
    %77 = vector.load %arg5[%c2_57, %c1_58, %c0_59, %c0_60] : memref<3x2x1x128xf32, #tpu.memory_space<vmem>>, vector<1x1x1x128xf32>
    %78 = vector.shape_cast %77 : vector<1x1x1x128xf32> to vector<1x128xf32>
    %79 = vector.broadcast %78 : vector<1x128xf32> to vector<16x128xf32>
    %80 = arith.addf %76, %79 : vector<16x128xf32>
    %81 = arith.addf %80, %59 : vector<16x128xf32>
    %cst_61 = arith.constant 0.000000e+00 : f32
    %82 = vector.broadcast %cst_61 : f32 to vector<16x128xf32>
    %83 = arith.cmpf ogt, %81, %82 : vector<16x128xf32>
    %cst_62 = arith.constant 2.000000e-01 : f32
    %84 = vector.broadcast %cst_62 : f32 to vector<16x128xf32>
    %85 = arith.mulf %84, %81 : vector<16x128xf32>
    %86 = arith.select %83, %81, %85 : vector<16x128xi1>, vector<16x128xf32>
    %87 = arith.truncf %86 : vector<16x128xf32> to vector<16x128xbf16>
    %c0_63 = arith.constant 0 : index
    %c0_64 = arith.constant 0 : index
    %88 = vector.load %arg7[%c0_63, %c0_64] : memref<128x128xbf16, #tpu.memory_space<vmem>>, vector<128x128xbf16>
    %cst_65 = arith.constant dense<0.000000e+00> : vector<16x128xf32>
    %89 = tpu.matmul %87, %88, %cst_65 {dimension_numbers = #tpu.dot_dimension_numbers<[1], [0], [0], [1], [0, 0, 1, 1], [], []>} : vector<16x128xbf16>, vector<128x128xbf16>, vector<16x128xf32> -> vector<16x128xf32>
    %c0_66 = arith.constant 0 : index
    %c0_67 = arith.constant 0 : index
    %90 = vector.load %arg8[%c0_66, %c0_67] : memref<1x128xf32, #tpu.memory_space<vmem>>, vector<1x128xf32>
    %91 = vector.broadcast %90 : vector<1x128xf32> to vector<16x128xf32>
    %92 = arith.addf %89, %91 : vector<16x128xf32>
    %93 = math.tanh %92 : vector<16x128xf32>
    %94 = arith.truncf %93 : vector<16x128xf32> to vector<16x128xbf16>
    %c0_68 = arith.constant 0 : index
    %c0_69 = arith.constant 0 : index
    %95 = vector.load %arg9[%c0_68, %c0_69] : memref<16x128xbf16, #tpu.memory_space<vmem>>, vector<16x128xbf16>
    tpu.vector_store %arg9[%c0_68, %c0_69], %94 {strides = array<i32>} : memref<16x128xbf16, #tpu.memory_space<vmem>>, vector<16x128xbf16>,
    return
  }
  func.func @transform_0(%arg0: i32) -> (i32, i32) {
    %c0_i32 = arith.constant 0 : i32
    %c0_i32_0 = arith.constant 0 : i32
    return %arg0, %c0_i32 : i32, i32
  }
  func.func @transform_1(%arg0: i32) -> (i32, i32) {
    %c0_i32 = arith.constant 0 : i32
    %c0_i32_0 = arith.constant 0 : i32
    %c0_i32_1 = arith.constant 0 : i32
    return %c0_i32, %c0_i32_0 : i32, i32
  }
  func.func @transform_2(%arg0: i32) -> (i32, i32) {
    %c0_i32 = arith.constant 0 : i32
    %c0_i32_0 = arith.constant 0 : i32
    %c0_i32_1 = arith.constant 0 : i32
    return %c0_i32, %c0_i32_0 : i32, i32
  }
  func.func @transform_3(%arg0: i32) -> (i32, i32, i32) {
    %c0_i32 = arith.constant 0 : i32
    %c0_i32_0 = arith.constant 0 : i32
    %c0_i32_1 = arith.constant 0 : i32
    %c0_i32_2 = arith.constant 0 : i32
    return %c0_i32, %c0_i32_0, %c0_i32_1 : i32, i32, i32
  }
  func.func @transform_4(%arg0: i32) -> (i32, i32, i32, i32) {
    %c0_i32 = arith.constant 0 : i32
    %c0_i32_0 = arith.constant 0 : i32
    %c0_i32_1 = arith.constant 0 : i32
    %c0_i32_2 = arith.constant 0 : i32
    %c0_i32_3 = arith.constant 0 : i32
    return %c0_i32, %c0_i32_0, %c0_i32_1, %c0_i32_2 : i32, i32, i32, i32
  }
  func.func @transform_5(%arg0: i32) -> (i32, i32, i32) {
    %c0_i32 = arith.constant 0 : i32
    %c0_i32_0 = arith.constant 0 : i32
    %c0_i32_1 = arith.constant 0 : i32
    %c0_i32_2 = arith.constant 0 : i32
    return %c0_i32, %c0_i32_0, %c0_i32_1 : i32, i32, i32
  }
  func.func @transform_6(%arg0: i32) -> (i32, i32) {
    %c0_i32 = arith.constant 0 : i32
    %c0_i32_0 = arith.constant 0 : i32
    %c0_i32_1 = arith.constant 0 : i32
    return %c0_i32, %c0_i32_0 : i32, i32
  }
  func.func @transform_7(%arg0: i32) -> (i32, i32) {
    %c0_i32 = arith.constant 0 : i32
    %c0_i32_0 = arith.constant 0 : i32
    %c0_i32_1 = arith.constant 0 : i32
    return %c0_i32, %c0_i32_0 : i32, i32
  }
  func.func @transform_8(%arg0: i32) -> (i32, i32) {
    %c0_i32 = arith.constant 0 : i32
    %c0_i32_0 = arith.constant 0 : i32
    return %arg0, %c0_i32 : i32, i32
  }
}

</mosaic_0001>

<bundles_post_ra>
// kernel: tpu_custom_call.1
= control target key start
LH: loop header
LB: loop body
LE: loop exit
PB: predicated region body
PF: predicated region fallthrough
CT: control target
= control target key end

     0   :  { %13 = vsyncpa [#allocation3], 0  ;;  %s1909_s0 = inlined_call_operand.hbm [shape: bf16[16,128], index: 0, kind: input, shape index: {}]   ;;  %s1910_s1 = inlined_call_operand.hbm [shape: bf16[128,128], index: 1, kind: input, shape index: {}]   ;;  %s1911_s2 = inlined_call_operand.vmem [shape: f32[1,128], index: 2, kind: input, shape index: {}]   ;;  %s1912_s3 = inlined_call_operand.hbm [shape: bf16[3,128,128], index: 3, kind: input, shape index: {}]   ;;  %s1913_s4 = inlined_call_operand.vmem [shape: f32[3,2,1,128], index: 4, kind: input, shape index: {}]   ;;  %s1914_s5 = inlined_call_operand.hbm [shape: bf16[3,128,128], index: 5, kind: input, shape index: {}]   ;;  %s1915_s6 = inlined_call_operand.hbm [shape: bf16[128,128], index: 6, kind: input, shape index: {}]   ;;  %s1916_s7 = inlined_call_operand.vmem [shape: f32[1,128], index: 7, kind: input, shape index: {}]   ;;  %s1917_s8 = inlined_call_operand.hbm [shape: bf16[16,128], index: 8, kind: output, shape index: {}]  }
   0x1   :  { %14 = vsyncpa [#allocation6], 0 }
   0x2   :  { %15 = vsyncpa [#allocation9], 0 }
   0x3   :  { %16 = vsyncpa [#allocation4], 0  ;;  %s1630_s27 = smov [#allocation5]   ;;  %s1631_s29 = smov [#allocation8]  }
   0x4   :  { %s34_s28 = sshll.u32 %s1630_s27, 4  ;;  %s62_s30 = sshll.u32 %s1631_s29, 4  ;;  %s35_s28 = int_to_ptr.vmem [resolvable:$true] %s34_s28  ;;  %s1685_s30 = int_to_ptr.vmem [resolvable:$true] %s62_s30 }
   0x5   :  { %s1490_s11 = scalar_lea.hbm %s1910_s1, 1024 }
   0x6   :  { %p1491_p0 = scmp.ne.s32.totalorder %s1910_s1, %s1490_s11  ;;  %p1494_p1 = scmp.lt.u32.totalorder %s1490_s11, %s1910_s1 }
   0x8   :  { %p1496_p2 = pnand %p1494_p1, %p1491_p0 }
   0xa   :  { %1499 = shalt.err (!%p1496_p2)
}
   0xb   :  { %s1500_s16 = scalar_lea.vmem %s35_s28, 1024  ;;  %p1505_p4 = scmp.lt.s32.totalorder %s35_s28, %s35_s28 }
   0xc   :  { %p1501_p3 = scmp.ne.s32.totalorder %s35_s28, %s1500_s16  ;;  %p1506_p5 = scmp.lt.s32.totalorder %s1500_s16, %s1500_s16 }
   0xe   :  { %p1507_p6 = por %p1506_p5, %p1505_p4 }
  0x10   :  { %p1508_p7 = pnand %p1507_p6, %p1501_p3 }
  0x12   :  { %1511 = shalt.err (!%p1508_p7)
}
  0x13   :  { %s1632_s17 = smov 64   ;;  %s1633_s18 = smov 4  }
  0x14   :  { %40 = dma.hbm_to_vmem [thread:$0]  %s1910_s1, 1024, %s35_s28, [#allocation6], %s1632_s17, %s1632_s17, %s1633_s18  }
  0x15   :  { %s1512_s23 = scalar_lea.hbm %s1914_s5, 3072 }
  0x16   :  { %p1513_p8 = scmp.ne.s32.totalorder %s1914_s5, %s1512_s23  ;;  %p1516_p9 = scmp.lt.u32.totalorder %s1512_s23, %s1914_s5 }
  0x18   :  { %p1518_p10 = pnand %p1516_p9, %p1513_p8 }
  0x1a   :  { %1521 = shalt.err (!%p1518_p10)
}
  0x1b   :  { %s1522_s29 = scalar_lea.vmem %s1685_s30, 3072  ;;  %p1527_p12 = scmp.lt.s32.totalorder %s1685_s30, %s1685_s30 }
  0x1c   :  { %p1523_p11 = scmp.ne.s32.totalorder %s1685_s30, %s1522_s29  ;;  %p1528_p13 = scmp.lt.s32.totalorder %s1522_s29, %s1522_s29 }
  0x1e   :  { %p1529_p0 = por %p1528_p13, %p1527_p12 }
  0x20   :  { %p1530_p1 = pnand %p1529_p0, %p1523_p11 }
  0x22   :  { %1533 = shalt.err (!%p1530_p1)
}
  0x23   :  { %68 = dma.hbm_to_vmem [thread:$0]  %s1914_s5, 3072, %s1685_s30, [#allocation9], %s1632_s17, %s1632_s17, %s1633_s18  }
  0x24   :  { %s1634_s9 = smov [#allocation2]   ;;  %s1635_s11 = smov [#allocation7]  }
  0x25   :  { %s22_s10 = sshll.u32 %s1634_s9, 4  ;;  %s48_s12 = sshll.u32 %s1635_s11, 4  ;;  %s23_s10 = int_to_ptr.vmem [resolvable:$true] %s22_s10  ;;  %s1722_s12 = int_to_ptr.vmem [resolvable:$true] %s48_s12 }
  0x26   :  { %s1534_s15 = scalar_lea.hbm %s1909_s0, 128 }
  0x27   :  { %p1535_p2 = scmp.ne.s32.totalorder %s1909_s0, %s1534_s15  ;;  %p1538_p3 = scmp.lt.u32.totalorder %s1534_s15, %s1909_s0 }
  0x29   :  { %p1540_p4 = pnand %p1538_p3, %p1535_p2 }
  0x2b   :  { %1543 = shalt.err (!%p1540_p4)
}
  0x2c   :  { %s1544_s5 = scalar_lea.vmem %s23_s10, 128  ;;  %p1549_p6 = scmp.lt.s32.totalorder %s23_s10, %s23_s10 }
  0x2d   :  { %p1545_p5 = scmp.ne.s32.totalorder %s23_s10, %s1544_s5  ;;  %p1550_p7 = scmp.lt.s32.totalorder %s1544_s5, %s1544_s5 }
  0x2f   :  { %p1551_p8 = por %p1550_p7, %p1549_p6 }
  0x31   :  { %p1552_p9 = pnand %p1551_p8, %p1545_p5 }
  0x33   :  { %1555 = shalt.err (!%p1552_p9)
}
  0x34   :  { %28 = dma.hbm_to_vmem [thread:$0]  %s1909_s0, 128, %s23_s10, [#allocation3], %s1632_s17, %s1632_s17, %s1633_s18  }
  0x35   :  { %s1556_s25 = scalar_lea.hbm %s1912_s3, 3072 }
  0x36   :  { %p1557_p10 = scmp.ne.s32.totalorder %s1912_s3, %s1556_s25  ;;  %p1560_p11 = scmp.lt.u32.totalorder %s1556_s25, %s1912_s3 }
  0x38   :  { %p1562_p12 = pnand %p1560_p11, %p1557_p10 }
  0x3a   :  { %1565 = shalt.err (!%p1562_p12)
}
  0x3b   :  { %s1566_s28 = scalar_lea.vmem %s1722_s12, 3072  ;;  %p1571_p0 = scmp.lt.s32.totalorder %s1722_s12, %s1722_s12 }
  0x3c   :  { %p1567_p13 = scmp.ne.s32.totalorder %s1722_s12, %s1566_s28  ;;  %p1572_p1 = scmp.lt.s32.totalorder %s1566_s28, %s1566_s28 }
  0x3e   :  { %p1573_p2 = por %p1572_p1, %p1571_p0 }
  0x40   :  { %p1574_p3 = pnand %p1573_p2, %p1567_p13 }
  0x42   :  { %1577 = shalt.err (!%p1574_p3)
}
  0x43   :  { %54 = dma.hbm_to_vmem [thread:$0]  %s1912_s3, 3072, %s1722_s12, [#allocation6], %s1632_s17, %s1632_s17, %s1633_s18  }
  0x44   :  { %s1636_s10 = smov [#allocation10]   ;;  %s1578_s15 = scalar_lea.hbm %s1915_s6, 1024 }
  0x45   :  { %s74_s11 = sshll.u32 %s1636_s10, 4  ;;  %p1579_p4 = scmp.ne.s32.totalorder %s1915_s6, %s1578_s15  ;;  %s75_s11 = int_to_ptr.vmem [resolvable:$true] %s74_s11 }
  0x46   :  { %p1582_p5 = scmp.lt.u32.totalorder %s1578_s15, %s1915_s6 }
  0x48   :  { %p1584_p6 = pnand %p1582_p5, %p1579_p4 }
  0x4a   :  { %1587 = shalt.err (!%p1584_p6)
}
  0x4b   :  { %s1588_s5 = scalar_lea.vmem %s75_s11, 1024  ;;  %p1593_p8 = scmp.lt.s32.totalorder %s75_s11, %s75_s11 }
  0x4c   :  { %p1589_p7 = scmp.ne.s32.totalorder %s75_s11, %s1588_s5  ;;  %p1594_p9 = scmp.lt.s32.totalorder %s1588_s5, %s1588_s5 }
  0x4e   :  { %p1595_p10 = por %p1594_p9, %p1593_p8 }
  0x50   :  { %p1596_p11 = pnand %p1595_p10, %p1589_p7 }
  0x52   :  { %1599 = shalt.err (!%p1596_p11)
}
  0x53   :  { %80 = dma.hbm_to_vmem [thread:$0]  %s1915_s6, 1024, %s75_s11, [#allocation9], %s1632_s17, %s1632_s17, %s1633_s18  }
  0x54   :  { %1622 = dma.done.wait [#allocation3], 128  }
  0x55   :  { %1623 = vsyncadd [#allocation3], 4294967168 }
  0x56   :  { %1624 = dma.done.wait [#allocation6], 4096  }
  0x57   :  { %1625 = vsyncadd [#allocation6], 4294963200 }
  0x58   :  { %1626 = dma.done.wait [#allocation9], 4096  }
  0x59   :  { %1627 = vsyncadd [#allocation9], 4294963200  ;;  %v1637_v0 = vmov 0.0   ;;  %vm1638_vm0 = vmmov 0   ;;  %v1421_v1 = vld [vmem:[#allocation5] sm:$0xff]   ;;  %v1422_v2 = vld [vmem:[#allocation5 + $0x8] sm:$0xff]  }
  0x5a   :  { %1251 = vmatprep.subr.bf16.mxu0 %v1637_v0  ;;  %1267 = vmatprep.mubr.msk.bf16.mxu0 %vm1638_vm0, %v1637_v0  ;;  %v1423_v3 = vld [vmem:[#allocation5 + $0x10] sm:$0xff]   ;;  %v1430_v4 = vld [vmem:[#allocation7] sm:$0xff]   ;;  %v1424_v5 = vld [vmem:[#allocation5 + $0x18] sm:$0xff]  }
  0x5b   :  { %1271 = vmatprep.subr.bf16.mxu1 %v1637_v0  ;;  %1287 = vmatprep.mubr.msk.bf16.mxu1 %vm1638_vm0, %v1637_v0  ;;  %v1431_v6 = vld [vmem:[#allocation7 + $0x8] sm:$0xff]   ;;  %v1425_v7 = vld [vmem:[#allocation5 + $0x20] sm:$0xff]   ;;  %v1432_v8 = vld [vmem:[#allocation7 + $0x10] sm:$0xff]  }
  0x5c   :  { %1252 = vmatpush3.bf16.msra.mxu0 %v1421_v1  ;;  %1272 = vmatpush3.bf16.msra.mxu1 %v1430_v4  ;;  %v1426_v9 = vld [vmem:[#allocation5 + $0x28] sm:$0xff]   ;;  %v1433_v10 = vld [vmem:[#allocation7 + $0x18] sm:$0xff]   ;;  %v1427_v11 = vld [vmem:[#allocation5 + $0x30] sm:$0xff]  }
  0x5d   :  { %1253 = vmatprep.subr.bf16.mxu0 %v1637_v0  ;;  %1273 = vmatprep.subr.bf16.mxu1 %v1637_v0  ;;  %v1434_v12 = vld [vmem:[#allocation7 + $0x20] sm:$0xff]   ;;  %v1428_v13 = vld [vmem:[#allocation5 + $0x38] sm:$0xff]   ;;  %v1435_v14 = vld [vmem:[#allocation7 + $0x28] sm:$0xff]  }
  0x5e   :  { %v1429_v15 = vld [vmem:[#allocation2] sm:$0xff]   ;;  %v1436_v16 = vld [vmem:[#allocation7 + $0x30] sm:$0xff]   ;;  %v1438_v18 = vld [vmem:[#allocation8] sm:$0xff]  }
  0x5f   :  { %v1437_v17 = vld [vmem:[#allocation7 + $0x38] sm:$0xff]   ;;  %v1439_v19 = vld [vmem:[#allocation8 + $0x8] sm:$0xff]   ;;  %v1440_v20 = vld [vmem:[#allocation8 + $0x10] sm:$0xff]  }
  0x60   :  { %1254 = vmatpush3.bf16.msra.mxu0 %v1422_v2  ;;  %1274 = vmatpush3.bf16.msra.mxu1 %v1431_v6  ;;  %v1441_v21 = vld [vmem:[#allocation8 + $0x18] sm:$0xff]   ;;  %v1442_v22 = vld [vmem:[#allocation8 + $0x20] sm:$0xff]   ;;  %v1443_v23 = vld [vmem:[#allocation8 + $0x28] sm:$0xff]  }
  0x61   :  { %1255 = vmatprep.subr.bf16.mxu0 %v1637_v0  ;;  %1275 = vmatprep.subr.bf16.mxu1 %v1637_v0  ;;  %v1092_v24 = vld [vmem:[%s1911_s2] ss:$0 sm:$0xff]  ;;  %v1444_v32 = vld [vmem:[#allocation8 + $0x30] sm:$0xff]   ;;  %v1446_v34 = vld [vmem:[#allocation7 + $0x40] sm:$0xff]  }
  0x62   :  { %v1445_v33 = vld [vmem:[#allocation8 + $0x38] sm:$0xff]   ;;  %v1447_v35 = vld [vmem:[#allocation7 + $0x48] sm:$0xff]   ;;  %v1448_v36 = vld [vmem:[#allocation7 + $0x50] sm:$0xff]  }
  0x63   :  { %v1449_v37 = vld [vmem:[#allocation7 + $0x58] sm:$0xff]   ;;  %v1450_v38 = vld [vmem:[#allocation7 + $0x60] sm:$0xff]   ;;  %v1451_v51 = vld [vmem:[#allocation7 + $0x68] sm:$0xff]  }
  0x64   :  { %1256 = vmatpush3.bf16.msra.mxu0 %v1423_v3  ;;  %1276 = vmatpush3.bf16.msra.mxu1 %v1432_v8  ;;  %v1102_v39 = vld [vmem:[%s1913_s4] ss:$0 sm:$0xff]  ;;  %v1452_v52 = vld [vmem:[#allocation7 + $0x70] sm:$0xff]   ;;  %v1454_v54 = vld [vmem:[#allocation8 + $0x40] sm:$0xff]  }
  0x65   :  { %1257 = vmatprep.subr.bf16.mxu0 %v1637_v0  ;;  %1277 = vmatprep.subr.bf16.mxu1 %v1637_v0  ;;  %v1453_v53 = vld [vmem:[#allocation7 + $0x78] sm:$0xff]   ;;  %v1455_v55 = vld [vmem:[#allocation8 + $0x48] sm:$0xff]   ;;  %v1456_v56 = vld [vmem:[#allocation8 + $0x50] sm:$0xff]  }
  0x66   :  { %v1457_v57 = vld [vmem:[#allocation8 + $0x58] sm:$0xff]   ;;  %v1458_v58 = vld [vmem:[#allocation8 + $0x60] sm:$0xff]   ;;  %v1459_v59 = vld [vmem:[#allocation8 + $0x68] sm:$0xff]  }
  0x67   :  { %v1112_v60 = vld [vmem:[%s1913_s4 + $0x1] ss:$0 sm:$0xff] }
  0x68   :  { %1258 = vmatpush3.bf16.msra.mxu0 %v1424_v5  ;;  %1278 = vmatpush3.bf16.msra.mxu1 %v1433_v10 }
  0x69   :  { %1259 = vmatprep.subr.bf16.mxu0 %v1637_v0  ;;  %1279 = vmatprep.subr.bf16.mxu1 %v1637_v0 }
  0x6c   :  { %1260 = vmatpush3.bf16.msra.mxu0 %v1425_v7  ;;  %1280 = vmatpush3.bf16.msra.mxu1 %v1434_v12  ;;  %v1461_v12 = vld [vmem:[#allocation8 + $0x78] sm:$0xff]  }
  0x6d   :  { %1261 = vmatprep.subr.bf16.mxu0 %v1637_v0  ;;  %1281 = vmatprep.subr.bf16.mxu1 %v1637_v0 }
  0x70   :  { %1262 = vmatpush3.bf16.msra.mxu0 %v1426_v9  ;;  %1282 = vmatpush3.bf16.msra.mxu1 %v1435_v14  ;;  %v1463_v14 = vld [vmem:[#allocation7 + $0x88] sm:$0xff]  }
  0x71   :  { %1263 = vmatprep.subr.bf16.mxu0 %v1637_v0  ;;  %1283 = vmatprep.subr.bf16.mxu1 %v1637_v0 }
  0x74   :  { %1264 = vmatpush3.bf16.msra.mxu0 %v1427_v11  ;;  %1284 = vmatpush3.bf16.msra.mxu1 %v1436_v16  ;;  %v1460_v11 = vld [vmem:[#allocation8 + $0x70] sm:$0xff]   ;;  %v1465_v16 = vld [vmem:[#allocation7 + $0x98] sm:$0xff]  }
  0x75   :  { %1265 = vmatprep.subr.bf16.mxu0 %v1637_v0  ;;  %1285 = vmatprep.subr.bf16.mxu1 %v1637_v0 }
  0x78   :  { %1266 = vmatpush3.bf16.msra.mxu0 %v1428_v13  ;;  %1286 = vmatpush3.bf16.msra.mxu1 %v1437_v17  ;;  %v1462_v13 = vld [vmem:[#allocation7 + $0x80] sm:$0xff]  }
  0x79   :  { %1291 = vmatprep.subr.bf16.mxu0 %v1637_v0  ;;  %1311 = vmatprep.subr.bf16.mxu1 %v1637_v0  ;;  %v1466_v17 = vld [vmem:[#allocation7 + $0xa0] sm:$0xff]  }
  0x7b   :  { %1268 = vmatmul.mubr.bf16.vlgmr.msra.gmra.mrb[0].mxu0 %v1429_v15  ;;  %v1464_v15 = vld [vmem:[#allocation7 + $0x90] sm:$0xff]  }
  0x7c   :  { %1307 = vmatprep.mubr.msk.bf16.mxu0 %vm1638_vm0, %v1637_v0  ;;  %1292 = vmatpush3.bf16.msra.mxu0 %v1438_v18  ;;  %v1122_v18 = vld [vmem:[%s1913_s4 + $0x2] ss:$0 sm:$0xff] }
  0x7d   :  { %1293 = vmatprep.subr.bf16.mxu0 %v1637_v0 }
  0x80   :  { %1294 = vmatpush3.bf16.msra.mxu0 %v1439_v19 }
  0x81   :  { %1295 = vmatprep.subr.bf16.mxu0 %v1637_v0 }
  0x84   :  { %1296 = vmatpush3.bf16.msra.mxu0 %v1440_v20 }
  0x85   :  { %1297 = vmatprep.subr.bf16.mxu0 %v1637_v0 }
  0x88   :  { %1298 = vmatpush3.bf16.msra.mxu0 %v1441_v21 }
  0x89   :  { %1299 = vmatprep.subr.bf16.mxu0 %v1637_v0 }
  0x8c   :  { %1300 = vmatpush3.bf16.msra.mxu0 %v1442_v22 }
  0x8d   :  { %1301 = vmatprep.subr.bf16.mxu0 %v1637_v0 }
  0x90   :  { %1302 = vmatpush3.bf16.msra.mxu0 %v1443_v23 }
  0x91   :  { %1303 = vmatprep.subr.bf16.mxu0 %v1637_v0 }
  0x94   :  { %1304 = vmatpush3.bf16.msra.mxu0 %v1444_v32  ;;  %v1469_v32 = vld [vmem:[#allocation7 + $0xb8] sm:$0xff]  }
  0x95   :  { %1305 = vmatprep.subr.bf16.mxu0 %v1637_v0 }
  0x98   :  { %1306 = vmatpush3.bf16.msra.mxu0 %v1445_v33  ;;  %v1470_v33 = vld [vmem:[#allocation8 + $0x80] sm:$0xff]  }
  0x99   :  { %1331 = vmatprep.subr.bf16.mxu0 %v1637_v0 }
 0x14e   :  { %v212_v25 = vpop.f32.mrb[0].mxu0 }
 0x14f   :  { %v1269_v26 = vpop.f32.mrb[1].mxu0  ;;  %v1807_v28 = vadd.f32 %v1092_v24, %v212_v25 }
 0x150   :  { %v215_v27 = vpop.f32.mrb[2].mxu0 }
 0x151   :  { %v1809_v29 = vadd.f32 %v1092_v24, %v215_v27  ;;  %v1270_v30 = vpop.f32.mrb[3].mxu0 }
 0x152   :  { %v1467_v30 = vld [vmem:[#allocation7 + $0xa8] sm:$0xff]  }
 0x153   :  { %v219_v31 = vpack.c.bf16 %v1809_v29, %v1807_v28 }
 0x155   :  { %1288 = vmatmul.mubr.bf16.vlgmr.msra.gmra.mrb[0].mxu1 %v219_v31  ;;  %v1468_v31 = vld [vmem:[#allocation7 + $0xb0] sm:$0xff]  }
 0x156   :  { %1327 = vmatprep.mubr.msk.bf16.mxu1 %vm1638_vm0, %v1637_v0  ;;  %1312 = vmatpush3.bf16.msra.mxu1 %v1446_v34  ;;  %v1471_v34 = vld [vmem:[#allocation8 + $0x88] sm:$0xff]  }
 0x157   :  { %1313 = vmatprep.subr.bf16.mxu1 %v1637_v0 }
 0x15a   :  { %1314 = vmatpush3.bf16.msra.mxu1 %v1447_v35  ;;  %v1472_v35 = vld [vmem:[#allocation8 + $0x90] sm:$0xff]  }
 0x15b   :  { %1315 = vmatprep.subr.bf16.mxu1 %v1637_v0 }
 0x15e   :  { %1316 = vmatpush3.bf16.msra.mxu1 %v1448_v36  ;;  %v1473_v36 = vld [vmem:[#allocation8 + $0x98] sm:$0xff]  }
 0x15f   :  { %1317 = vmatprep.subr.bf16.mxu1 %v1637_v0 }
 0x162   :  { %1318 = vmatpush3.bf16.msra.mxu1 %v1449_v37  ;;  %v1474_v37 = vld [vmem:[#allocation8 + $0xa0] sm:$0xff]  }
 0x163   :  { %1319 = vmatprep.subr.bf16.mxu1 %v1637_v0 }
 0x166   :  { %1320 = vmatpush3.bf16.msra.mxu1 %v1450_v38  ;;  %v1475_v38 = vld [vmem:[#allocation8 + $0xa8] sm:$0xff]  }
 0x167   :  { %1321 = vmatprep.subr.bf16.mxu1 %v1637_v0 }
 0x16a   :  { %1322 = vmatpush3.bf16.msra.mxu1 %v1451_v51 }
 0x16b   :  { %1323 = vmatprep.subr.bf16.mxu1 %v1637_v0 }
 0x16e   :  { %1324 = vmatpush3.bf16.msra.mxu1 %v1452_v52 }
 0x16f   :  { %1325 = vmatprep.subr.bf16.mxu1 %v1637_v0 }
 0x172   :  { %1326 = vmatpush3.bf16.msra.mxu1 %v1453_v53  ;;  %v1476_v53 = vld [vmem:[#allocation8 + $0xb0] sm:$0xff]  }
 0x173   :  { %1351 = vmatprep.subr.bf16.mxu1 %v1637_v0 }
 0x228   :  { %v325_v40 = vpop.f32.mrb[0].mxu1 }
 0x229   :  { %v326_v41 = vadd.f32 %v1102_v39, %v325_v40  ;;  %v1289_v42 = vpop.f32.mrb[1].mxu1 }
 0x22a   :  { %v328_v43 = vpop.f32.mrb[2].mxu1 }
 0x22b   :  { %v334_v44 = vmul.f32 0.2, %v326_v41  ;;  %v329_v45 = vadd.f32 %v1102_v39, %v328_v43  ;;  %v1290_v46 = vpop.f32.mrb[3].mxu1  ;;  %vm332_vm1 = vcmp.gt.f32.partialorder %v326_v41, 0.0  ;;  %v1132_v39 = vld [vmem:[%s1913_s4 + $0x3] ss:$0 sm:$0xff] }
 0x22d   :  { %vm333_vm2 = vcmp.gt.f32.partialorder %v329_v45, 0.0  ;;  %v335_v47 = vmul.f32 0.2, %v329_v45  ;;  %v336_v48 = vsel %vm332_vm1, %v326_v41, %v334_v44 }
 0x22f   :  { %v337_v49 = vsel %vm333_vm2, %v329_v45, %v335_v47 }
 0x230   :  { %v338_v50 = vpack.c.bf16 %v337_v49, %v336_v48 }
 0x232   :  { %1308 = vmatmul.mubr.bf16.vlgmr.msra.gmra.mrb[4].mxu0 %v338_v50 }
 0x233   :  { %1347 = vmatprep.mubr.msk.bf16.mxu0 %vm1638_vm0, %v1637_v0  ;;  %1332 = vmatpush3.bf16.msra.mxu0 %v1454_v54  ;;  %v1477_v54 = vld [vmem:[#allocation8 + $0xb8] sm:$0xff]  }
 0x234   :  { %1333 = vmatprep.subr.bf16.mxu0 %v1637_v0 }
 0x237   :  { %1334 = vmatpush3.bf16.msra.mxu0 %v1455_v55  ;;  %v1478_v55 = vld [vmem:[#allocation10] sm:$0xff]  }
 0x238   :  { %1335 = vmatprep.subr.bf16.mxu0 %v1637_v0 }
 0x23b   :  { %1336 = vmatpush3.bf16.msra.mxu0 %v1456_v56  ;;  %v1479_v56 = vld [vmem:[#allocation10 + $0x8] sm:$0xff]  }
 0x23c   :  { %1337 = vmatprep.subr.bf16.mxu0 %v1637_v0 }
 0x23f   :  { %1338 = vmatpush3.bf16.msra.mxu0 %v1457_v57  ;;  %v1480_v57 = vld [vmem:[#allocation10 + $0x10] sm:$0xff]  }
 0x240   :  { %1339 = vmatprep.subr.bf16.mxu0 %v1637_v0 }
 0x243   :  { %1340 = vmatpush3.bf16.msra.mxu0 %v1458_v58  ;;  %v1481_v58 = vld [vmem:[#allocation10 + $0x18] sm:$0xff]  }
 0x244   :  { %1341 = vmatprep.subr.bf16.mxu0 %v1637_v0 }
 0x247   :  { %1342 = vmatpush3.bf16.msra.mxu0 %v1459_v59  ;;  %v1482_v59 = vld [vmem:[#allocation10 + $0x20] sm:$0xff]  }
 0x248   :  { %1343 = vmatprep.subr.bf16.mxu0 %v1637_v0 }
 0x24b   :  { %1344 = vmatpush3.bf16.msra.mxu0 %v1460_v11  ;;  %v1485_v11 = vld [vmem:[#allocation10 + $0x38] sm:$0xff]  }
 0x24c   :  { %1345 = vmatprep.subr.bf16.mxu0 %v1637_v0 }
 0x24f   :  { %1346 = vmatpush3.bf16.msra.mxu0 %v1461_v12  ;;  %v1152_v12 = vld [vmem:[%s1913_s4 + $0x5] ss:$0 sm:$0xff] }
 0x250   :  { %1371 = vmatprep.subr.bf16.mxu0 %v1637_v0 }
 0x305   :  { %v445_v61 = vpop.f32.mrb[4].mxu0 }
 0x306   :  { %v446_v62 = vadd.f32 %v1112_v60, %v445_v61  ;;  %v1309_v63 = vpop.f32.mrb[5].mxu0 }
 0x307   :  { %v448_v1 = vpop.f32.mrb[6].mxu0 }
 0x308   :  { %v452_v2 = vadd.f32 %v446_v62, %v1807_v28  ;;  %v449_v3 = vadd.f32 %v1112_v60, %v448_v1  ;;  %v1310_v4 = vpop.f32.mrb[7].mxu0  ;;  %v1142_v60 = vld [vmem:[%s1913_s4 + $0x4] ss:$0 sm:$0xff]  ;;  %s1639_s4 = smov [#allocation11]  }
 0x309   :  { %s1078_s13 = sshll.u32 %s1639_s4, 4  ;;  %s1079_s13 = int_to_ptr.vmem [resolvable:$true] %s1078_s13 }
 0x30a   :  { %v456_v5 = vmul.f32 0.2, %v452_v2  ;;  %v453_v6 = vadd.f32 %v449_v3, %v1809_v29  ;;  %vm454_vm3 = vcmp.gt.f32.partialorder %v452_v2, 0.0  ;;  %s1600_s14 = scalar_lea.vmem %s1079_s13, 128  ;;  %p1605_p13 = scmp.lt.s32.totalorder %s1079_s13, %s1079_s13 }
 0x30b   :  { %p1601_p12 = scmp.ne.s32.totalorder %s1079_s13, %s1600_s14  ;;  %p1606_p0 = scmp.lt.s32.totalorder %s1600_s14, %s1600_s14 }
 0x30c   :  { %vm455_vm4 = vcmp.gt.f32.partialorder %v453_v6, 0.0  ;;  %v457_v7 = vmul.f32 0.2, %v453_v6  ;;  %v1841_v8 = vsel %vm454_vm3, %v452_v2, %v456_v5 }
 0x30d   :  { %p1607_p1 = por %p1606_p0, %p1605_p13 }
 0x30e   :  { %v1843_v9 = vsel %vm455_vm4, %v453_v6, %v457_v7 }
 0x30f   :  { %v460_v10 = vpack.c.bf16 %v1843_v9, %v1841_v8  ;;  %p1608_p2 = pnand %p1607_p1, %p1601_p12 }
 0x311   :  { %1328 = vmatmul.mubr.bf16.vlgmr.msra.gmra.mrb[4].mxu1 %v460_v10  ;;  %v1484_v10 = vld [vmem:[#allocation10 + $0x30] sm:$0xff]  }
 0x312   :  { %1367 = vmatprep.mubr.msk.bf16.mxu1 %vm1638_vm0, %v1637_v0  ;;  %1352 = vmatpush3.bf16.msra.mxu1 %v1462_v13 }
 0x313   :  { %1353 = vmatprep.subr.bf16.mxu1 %v1637_v0 }
 0x316   :  { %1354 = vmatpush3.bf16.msra.mxu1 %v1463_v14 }
 0x317   :  { %1355 = vmatprep.subr.bf16.mxu1 %v1637_v0 }
 0x31a   :  { %1356 = vmatpush3.bf16.msra.mxu1 %v1464_v15 }
 0x31b   :  { %1357 = vmatprep.subr.bf16.mxu1 %v1637_v0 }
 0x31e   :  { %1358 = vmatpush3.bf16.msra.mxu1 %v1465_v16 }
 0x31f   :  { %1359 = vmatprep.subr.bf16.mxu1 %v1637_v0 }
 0x322   :  { %1360 = vmatpush3.bf16.msra.mxu1 %v1466_v17 }
 0x323   :  { %1361 = vmatprep.subr.bf16.mxu1 %v1637_v0 }
 0x326   :  { %1362 = vmatpush3.bf16.msra.mxu1 %v1467_v30 }
 0x327   :  { %1363 = vmatprep.subr.bf16.mxu1 %v1637_v0 }
 0x32a   :  { %1364 = vmatpush3.bf16.msra.mxu1 %v1468_v31 }
 0x32b   :  { %1365 = vmatprep.subr.bf16.mxu1 %v1637_v0 }
 0x32e   :  { %1366 = vmatpush3.bf16.msra.mxu1 %v1469_v32 }
 0x32f   :  { %1391 = vmatprep.subr.bf16.mxu1 %v1637_v0 }
 0x3e4   :  { %v568_v19 = vpop.f32.mrb[4].mxu1 }
 0x3e5   :  { %v569_v20 = vadd.f32 %v1122_v18, %v568_v19  ;;  %v1329_v21 = vpop.f32.mrb[5].mxu1 }
 0x3e6   :  { %v571_v22 = vpop.f32.mrb[6].mxu1 }
 0x3e7   :  { %v577_v23 = vmul.f32 0.2, %v569_v20  ;;  %v572_v24 = vadd.f32 %v1122_v18, %v571_v22  ;;  %v1330_v25 = vpop.f32.mrb[7].mxu1  ;;  %vm575_vm5 = vcmp.gt.f32.partialorder %v569_v20, 0.0 }
 0x3e8   :  { %v1161_v25 = vld [vmem:[%s1916_s7] ss:$0 sm:$0xff] }
 0x3e9   :  { %vm576_vm6 = vcmp.gt.f32.partialorder %v572_v24, 0.0  ;;  %v578_v26 = vmul.f32 0.2, %v572_v24  ;;  %v579_v27 = vsel %vm575_vm5, %v569_v20, %v577_v23 }
 0x3eb   :  { %v580_v28 = vsel %vm576_vm6, %v572_v24, %v578_v26 }
 0x3ec   :  { %v581_v29 = vpack.c.bf16 %v580_v28, %v579_v27 }
 0x3ee   :  { %1348 = vmatmul.mubr.bf16.vlgmr.msra.gmra.mrb[8].mxu0 %v581_v29 }
 0x3ef   :  { %1387 = vmatprep.mubr.msk.bf16.mxu0 %vm1638_vm0, %v1637_v0  ;;  %1372 = vmatpush3.bf16.msra.mxu0 %v1470_v33 }
 0x3f0   :  { %1373 = vmatprep.subr.bf16.mxu0 %v1637_v0 }
 0x3f3   :  { %1374 = vmatpush3.bf16.msra.mxu0 %v1471_v34 }
 0x3f4   :  { %1375 = vmatprep.subr.bf16.mxu0 %v1637_v0 }
 0x3f7   :  { %1376 = vmatpush3.bf16.msra.mxu0 %v1472_v35 }
 0x3f8   :  { %1377 = vmatprep.subr.bf16.mxu0 %v1637_v0 }
 0x3fb   :  { %1378 = vmatpush3.bf16.msra.mxu0 %v1473_v36 }
 0x3fc   :  { %1379 = vmatprep.subr.bf16.mxu0 %v1637_v0 }
 0x3ff   :  { %1380 = vmatpush3.bf16.msra.mxu0 %v1474_v37 }
 0x400   :  { %1381 = vmatprep.subr.bf16.mxu0 %v1637_v0 }
 0x403   :  { %1382 = vmatpush3.bf16.msra.mxu0 %v1475_v38 }
 0x404   :  { %1383 = vmatprep.subr.bf16.mxu0 %v1637_v0 }
 0x407   :  { %1384 = vmatpush3.bf16.msra.mxu0 %v1476_v53 }
 0x408   :  { %1385 = vmatprep.subr.bf16.mxu0 %v1637_v0 }
 0x40b   :  { %1386 = vmatpush3.bf16.msra.mxu0 %v1477_v54 }
 0x4c1   :  { %v689_v40 = vpop.f32.mrb[8].mxu0 }
 0x4c2   :  { %v690_v41 = vadd.f32 %v1132_v39, %v689_v40  ;;  %v1349_v42 = vpop.f32.mrb[9].mxu0 }
 0x4c3   :  { %v692_v43 = vpop.f32.mrb[10].mxu0 }
 0x4c4   :  { %v696_v44 = vadd.f32 %v690_v41, %v1841_v8  ;;  %v693_v45 = vadd.f32 %v1132_v39, %v692_v43  ;;  %v1350_v46 = vpop.f32.mrb[11].mxu0 }
 0x4c6   :  { %v700_v47 = vmul.f32 0.2, %v696_v44  ;;  %v697_v48 = vadd.f32 %v693_v45, %v1843_v9  ;;  %vm698_vm7 = vcmp.gt.f32.partialorder %v696_v44, 0.0  ;;  %v1483_v9 = vld [vmem:[#allocation10 + $0x28] sm:$0xff]  }
 0x4c8   :  { %vm699_vm8 = vcmp.gt.f32.partialorder %v697_v48, 0.0  ;;  %v701_v49 = vmul.f32 0.2, %v697_v48  ;;  %v702_v50 = vsel %vm698_vm7, %v696_v44, %v700_v47 }
 0x4ca   :  { %v703_v51 = vsel %vm699_vm8, %v697_v48, %v701_v49 }
 0x4cb   :  { %v704_v52 = vpack.c.bf16 %v703_v51, %v702_v50 }
 0x4cd   :  { %1368 = vmatmul.mubr.bf16.vlgmr.msra.gmra.mrb[8].mxu1 %v704_v52 }
 0x4ce   :  { %1407 = vmatprep.mubr.msk.bf16.mxu1 %vm1638_vm0, %v1637_v0  ;;  %1392 = vmatpush3.bf16.msra.mxu1 %v1478_v55 }
 0x4cf   :  { %1393 = vmatprep.subr.bf16.mxu1 %v1637_v0 }
 0x4d2   :  { %1394 = vmatpush3.bf16.msra.mxu1 %v1479_v56 }
 0x4d3   :  { %1395 = vmatprep.subr.bf16.mxu1 %v1637_v0 }
 0x4d6   :  { %1396 = vmatpush3.bf16.msra.mxu1 %v1480_v57 }
 0x4d7   :  { %1397 = vmatprep.subr.bf16.mxu1 %v1637_v0 }
 0x4da   :  { %1398 = vmatpush3.bf16.msra.mxu1 %v1481_v58 }
 0x4db   :  { %1399 = vmatprep.subr.bf16.mxu1 %v1637_v0 }
 0x4de   :  { %1400 = vmatpush3.bf16.msra.mxu1 %v1482_v59 }
 0x4df   :  { %1401 = vmatprep.subr.bf16.mxu1 %v1637_v0 }
 0x4e2   :  { %1402 = vmatpush3.bf16.msra.mxu1 %v1483_v9 }
 0x4e3   :  { %1403 = vmatprep.subr.bf16.mxu1 %v1637_v0 }
 0x4e6   :  { %1404 = vmatpush3.bf16.msra.mxu1 %v1484_v10 }
 0x4e7   :  { %1405 = vmatprep.subr.bf16.mxu1 %v1637_v0 }
 0x4ea   :  { %1406 = vmatpush3.bf16.msra.mxu1 %v1485_v11 }
 0x5a0   :  { %v812_v61 = vpop.f32.mrb[8].mxu1 }
 0x5a1   :  { %v813_v62 = vadd.f32 %v1142_v60, %v812_v61  ;;  %v1369_v63 = vpop.f32.mrb[9].mxu1 }
 0x5a2   :  { %v815_v1 = vpop.f32.mrb[10].mxu1 }
 0x5a3   :  { %v821_v2 = vmul.f32 0.2, %v813_v62  ;;  %v816_v3 = vadd.f32 %v1142_v60, %v815_v1  ;;  %v1370_v4 = vpop.f32.mrb[11].mxu1  ;;  %vm819_vm9 = vcmp.gt.f32.partialorder %v813_v62, 0.0 }
 0x5a5   :  { %vm820_vm10 = vcmp.gt.f32.partialorder %v816_v3, 0.0  ;;  %v822_v5 = vmul.f32 0.2, %v816_v3  ;;  %v823_v6 = vsel %vm819_vm9, %v813_v62, %v821_v2 }
 0x5a7   :  { %v824_v7 = vsel %vm820_vm10, %v816_v3, %v822_v5 }
 0x5a8   :  { %v825_v8 = vpack.c.bf16 %v824_v7, %v823_v6 }
 0x5aa   :  { %1388 = vmatmul.mubr.bf16.vlgmr.msra.gmra.mrb[12].mxu0 %v825_v8 }
 0x67d   :  { %v933_v13 = vpop.f32.mrb[12].mxu0 }
 0x67e   :  { %v934_v14 = vadd.f32 %v1152_v12, %v933_v13  ;;  %v1389_v15 = vpop.f32.mrb[13].mxu0 }
 0x67f   :  { %v936_v16 = vpop.f32.mrb[14].mxu0 }
 0x680   :  { %v940_v17 = vadd.f32 %v934_v14, %v702_v50  ;;  %v937_v18 = vadd.f32 %v1152_v12, %v936_v16  ;;  %v1390_v19 = vpop.f32.mrb[15].mxu0 }
 0x682   :  { %v944_v20 = vmul.f32 0.2, %v940_v17  ;;  %v941_v21 = vadd.f32 %v937_v18, %v703_v51  ;;  %vm942_vm11 = vcmp.gt.f32.partialorder %v940_v17, 0.0 }
 0x684   :  { %vm943_vm12 = vcmp.gt.f32.partialorder %v941_v21, 0.0  ;;  %v945_v22 = vmul.f32 0.2, %v941_v21  ;;  %v946_v23 = vsel %vm942_vm11, %v940_v17, %v944_v20 }
 0x686   :  { %v947_v0 = vsel %vm943_vm12, %v941_v21, %v945_v22 }
 0x687   :  { %v948_v24 = vpack.c.bf16 %v947_v0, %v946_v23 }
 0x689   :  { %1408 = vmatmul.mubr.bf16.vlgmr.msra.gmra.mrb[12].mxu1 %v948_v24 }
 0x75c   :  { %v1054_v26 = vpop.f32.mrb[12].mxu1 }
 0x75d   :  { %v1055_v27 = vadd.f32 %v1161_v25, %v1054_v26  ;;  %v1409_v28 = vpop.f32.mrb[13].mxu1 }
 0x75e   :  { %v1057_v29 = vpop.f32.mrb[14].mxu1 }
 0x75f   :  { %v1058_v30 = vadd.f32 %v1161_v25, %v1057_v29  ;;  %v1410_v31 = vpop.f32.mrb[15].mxu1  ;;  %1486 = vtanh.f32 %v1055_v27 }
 0x761   :  { %1488 = vtanh.f32 %v1058_v30 }
 0x769   :  { %v1487_v32 = vpop.eup %1486 }
 0x76b   :  { %v1489_v33 = vpop.eup %1488 }
 0x76c   :  { %v1177_v34 = vpack.c.bf16 %v1489_v33, %v1487_v32 }
 0x76e   :  { %1178 = vst [vmem:[#allocation11] sm:$0xff] %v1177_v34  }
 0x76f   :  { %1611 = shalt.err (!%p1608_p2)
}
 0x770   :  { %s1612_s16 = scalar_lea.hbm %s1917_s8, 128 }
 0x771   :  { %p1613_p3 = scmp.ne.s32.totalorder %s1917_s8, %s1612_s16  ;;  %p1616_p4 = scmp.lt.u32.totalorder %s1612_s16, %s1917_s8 }
 0x773   :  { %p1618_p5 = pnand %p1616_p4, %p1613_p3 }
 0x775   :  { %1621 = shalt.err (!%p1618_p5)
}
 0x776   :  { %1084 = dma.vmem_to_hbm [thread:$0]  %s1079_s13, 128, %s1917_s8, [#allocation4], %s1632_s17, %s1632_s17, %s1633_s18  }
 0x777   :  { %1628 = dma.done.wait [#allocation4], 128  }
 0x778   :  { %1629 = vsyncadd [#allocation4], 4294967168 }
 0x779   :  { %1088 = vsyncpa [#allocation3], 1 }
 0x77a   :  { %1089 = vsyncpa [#allocation6], 1 }
 0x77b   :  { %1090 = vsyncpa [#allocation9], 1 }
 0x77c   :  { %1091 = vsyncpa [#allocation4], 1 }

</bundles_post_ra>
